<compile_context>
chip_gen: v7x
topology: tpu7x:2x2x1
jax: 0.10.0
libtpu: 0.0.40
codegen_flags: <defaults>
</compile_context>

<pallas_src>
import functools

import jax
import jax.numpy as jnp
from jax.experimental import pallas as pl
from jax.experimental.pallas import tpu as pltpu


def softplus_inverse(x):
    # x + log(-expm1(-x)), same as the torch helper (float32 scalar here)
    x = jnp.asarray(x, jnp.float32)
    return x + jnp.log(-jnp.expm1(-x))


def _round_up(x, m):
    return ((x + m - 1) // m) * m


def _make_rbf_kernel(neg_width, exp_weighting, has_cutoff):
    """neg_width is a compile-time Python float; alpha arrives pre-negated in SMEM."""

    def kernel(alpha_ref, *refs):
        if has_cutoff:
            r_ref, cut_ref, center_ref, expand_ref, out_ref = refs
        else:
            r_ref, center_ref, expand_ref, out_ref = refs
            cut_ref = None

        a = alpha_ref[0, 0]                       # -softplus(alpha)
        r = r_ref[...]                            # (TB, P)  packed distances
        expalphar = jnp.exp(a * r)                # (TB, P)  small EUP cost (P lanes)

        E = expand_ref[...]                       # (P, P*R) 0/1 expansion matrix
        # Lane expansion on the idle MXU: (TB, P) @ (P, P*R) -> (TB, P*R)
        exp_wide = jnp.dot(expalphar, E, preferred_element_type=jnp.float32)

        diff = exp_wide - center_ref[...]         # (TB, P*R) full 128-lane width
        rbf = jnp.exp(neg_width * diff * diff)    # dominant EUP work, full lanes

        factor = None
        if has_cutoff:
            factor = cut_ref[...]                 # (TB, P)
        if exp_weighting:
            factor = expalphar if factor is None else factor * expalphar
        if factor is not None:
            rbf = rbf * jnp.dot(factor, E, preferred_element_type=jnp.float32)

        out_ref[...] = rbf                        # lane-dense (TB, 128) store

    return kernel


class ExpGaussianFunctionPallas:
    """JAX/Pallas port of Exp_Gaussian_function."""

    def __init__(self, num_radial, init_alpha=0.95, no_inf=False,
                 exp_weighting=False):
        self.num_radial = num_radial
        self.exp_weighting = exp_weighting
        if no_inf:
            self.center = jnp.linspace(1.0, 0.0, num_radial + 1,
                                       dtype=jnp.float32)[:-1]
            self.width = float(num_radial + 1)
        else:
            self.center = jnp.linspace(1.0, 0.0, num_radial,
                                       dtype=jnp.float32)
            self.width = float(num_radial)
        # deterministic parameter init, same as reset_parameters()
        self._alpha = jnp.asarray(softplus_inverse(init_alpha), jnp.float32)

        R = num_radial
        # pack P distances per 128-lane row when R divides 128; otherwise fall back
        self._pack = 128 // R if (R <= 128 and 128 % R == 0) else 1
        P = self._pack
        # lane-packed center row (1, P*R) and 0/1 expansion matrix (P, P*R)
        self._center_row = jnp.tile(self.center, P).reshape(1, P * R)
        self._expand = jnp.repeat(jnp.eye(P, dtype=jnp.float32), R, axis=1)

    def __call__(self, r, cutoff=None, *, block_rows=1024):
        R = self.num_radial
        P = self._pack
        W = P * R

        r_flat = jnp.reshape(r, (-1,)).astype(jnp.float32)
        N = r_flat.shape[0]

        rows = pl.cdiv(N, P)
        # big tiles, but keep >= 2 grid blocks when possible (v7x megacore);
        # rows per block must be a multiple of 8 (sublane alignment).
        tgt = max(8, min(block_rows, _round_up(pl.cdiv(rows, 2), 8)))
        rows_pad = _round_up(max(rows, 1), tgt)
        n_pad = rows_pad * P

        if n_pad != N:
            r_flat = jnp.pad(r_flat, (0, n_pad - N))
        r_packed = r_flat.reshape(rows_pad, P)

        has_cutoff = cutoff is not None
        if has_cutoff:
            cut_flat = jnp.reshape(cutoff, (-1,)).astype(jnp.float32)
            if n_pad != N:
                cut_flat = jnp.pad(cut_flat, (0, n_pad - N))
            cut_packed = cut_flat.reshape(rows_pad, P)

        neg_alpha = (-jax.nn.softplus(self._alpha)).reshape(1, 1)

        grid = (rows_pad // tgt,)
        smem_spec = pl.BlockSpec(memory_space=pltpu.MemorySpace.SMEM)
        row_spec = pl.BlockSpec((tgt, P), lambda i: (i, 0))
        center_spec = pl.BlockSpec((1, W), lambda i: (0, 0))
        expand_spec = pl.BlockSpec((P, W), lambda i: (0, 0))
        out_spec = pl.BlockSpec((tgt, W), lambda i: (i, 0))
        out_shape = jax.ShapeDtypeStruct((rows_pad, W), jnp.float32)
        cparams = pltpu.CompilerParams(dimension_semantics=("parallel",))

        kern = _make_rbf_kernel(neg_width=-self.width,
                                exp_weighting=self.exp_weighting,
                                has_cutoff=has_cutoff)

        if has_cutoff:
            in_specs = [smem_spec, row_spec, row_spec, center_spec, expand_spec]
            args = (neg_alpha, r_packed, cut_packed, self._center_row,
                    self._expand)
        else:
            in_specs = [smem_spec, row_spec, center_spec, expand_spec]
            args = (neg_alpha, r_packed, self._center_row, self._expand)

        out = pl.pallas_call(
            kern,
            out_shape=out_shape,
            grid_spec=pl.GridSpec(grid=grid, in_specs=in_specs,
                                  out_specs=out_spec),
            compiler_params=cparams,
        )(*args)

        # row-major metadata reshape: (rows_pad, P*R) -> (rows_pad*P, R)
        return out.reshape(rows_pad * P, R)[:N]


def _reference(r, center, width, alpha, cutoff=None, exp_weighting=False):
    expalphar = jnp.exp(-jax.nn.softplus(alpha) * jnp.reshape(r, (-1, 1)))
    rbf = jnp.exp(-width * (expalphar - center[None, :]) ** 2)
    if cutoff is not None:
        rbf = jnp.reshape(cutoff, (-1, 1)) * rbf
    if exp_weighting:
        rbf = rbf * expalphar
    return rbf


if __name__ == "__main__":
    key = jax.random.PRNGKey(0)
    k1, k2 = jax.random.split(key)

    num_radial = 32
    N = 256                                   # e.g. number of edges/distances
    r = jax.random.uniform(k1, (N,), jnp.float32, minval=0.0, maxval=5.0)
    cutoff = jax.random.uniform(k2, (N,), jnp.float32)

    # plain path (lane-packed, P = 4)
    mod = ExpGaussianFunctionPallas(num_radial, init_alpha=0.95,
                                    no_inf=False, exp_weighting=False)
    out = jax.block_until_ready(mod(r))
    ref = _reference(r, mod.center, mod.width, mod._alpha)
    assert out.shape == (N, num_radial)
    assert jnp.allclose(out, ref, atol=1e-5, rtol=1e-5)

    # cutoff + exp_weighting + no_inf path
    mod2 = ExpGaussianFunctionPallas(num_radial, init_alpha=0.95,
                                     no_inf=True, exp_weighting=True)
    out2 = jax.block_until_ready(mod2(r, cutoff))
    ref2 = _reference(r, mod2.center, mod2.width, mod2._alpha,
                      cutoff=cutoff, exp_weighting=True)
    assert jnp.allclose(out2, ref2, atol=1e-5, rtol=1e-5)

    # fallback path: R does not divide 128 -> P = 1
    mod3 = ExpGaussianFunctionPallas(20, init_alpha=0.95,
                                     no_inf=False, exp_weighting=False)
    out3 = jax.block_until_ready(mod3(r, cutoff))
    ref3 = _reference(r, mod3.center, mod3.width, mod3._alpha, cutoff=cutoff)
    assert out3.shape == (N, 20)
    assert jnp.allclose(out3, ref3, atol=1e-5, rtol=1e-5)

    print("KERNEL_OK")
</pallas_src>

<mosaic_0001>
module attributes {stable_mosaic.version = 11 : i64} {
  func.func @kernel(%arg0: i32, %arg1: memref<1x1xf32, #tpu.memory_space<smem>>, %arg2: memref<32x4xf32, #tpu.memory_space<vmem>>, %arg3: memref<1x128xf32, #tpu.memory_space<vmem>>, %arg4: memref<4x128xf32, #tpu.memory_space<vmem>>, %arg5: memref<32x128xf32, #tpu.memory_space<vmem>>) attributes {dimension_semantics = [#tpu.dimension_semantics<parallel>], iteration_bounds = array<i64: 2>, scalar_prefetch = 0 : i64, scratch_operands = 0 : i64, tpu.core_type = #tpu.core_type<tc>, window_params = [{transform_indices = @transform_0, window_bounds = array<i64: 1, 1>}, {transform_indices = @transform_1, window_bounds = array<i64: 32, 4>}, {pipeline_mode = #tpu.pipeline_mode<synchronous>, transform_indices = @transform_2, window_bounds = array<i64: 1, 128>}, {pipeline_mode = #tpu.pipeline_mode<synchronous>, transform_indices = @transform_3, window_bounds = array<i64: 4, 128>}, {transform_indices = @transform_4, window_bounds = array<i64: 32, 128>}]} {
    %c0 = arith.constant 0 : index
    %c0_0 = arith.constant 0 : index
    %0 = memref.load %arg1[%c0, %c0_0] : memref<1x1xf32, #tpu.memory_space<smem>>
    %c0_1 = arith.constant 0 : index
    %c0_2 = arith.constant 0 : index
    %1 = vector.load %arg2[%c0_1, %c0_2] : memref<32x4xf32, #tpu.memory_space<vmem>>, vector<32x4xf32>
    %2 = vector.broadcast %0 : f32 to vector<32x4xf32>
    %3 = arith.mulf %2, %1 : vector<32x4xf32>
    %4 = math.exp %3 : vector<32x4xf32>
    %c0_3 = arith.constant 0 : index
    %c0_4 = arith.constant 0 : index
    %5 = vector.load %arg4[%c0_3, %c0_4] : memref<4x128xf32, #tpu.memory_space<vmem>>, vector<4x128xf32>
    %cst = arith.constant dense<0.000000e+00> : vector<32x128xf32>
    %6 = tpu.matmul %4, %5, %cst {dimension_numbers = #tpu.dot_dimension_numbers<[1], [0], [0], [1], [0, 0, 1, 1], [], []>} : vector<32x4xf32>, vector<4x128xf32>, vector<32x128xf32> -> vector<32x128xf32>
    %c0_5 = arith.constant 0 : index
    %c0_6 = arith.constant 0 : index
    %7 = vector.load %arg3[%c0_5, %c0_6] : memref<1x128xf32, #tpu.memory_space<vmem>>, vector<1x128xf32>
    %8 = vector.broadcast %7 : vector<1x128xf32> to vector<32x128xf32>
    %9 = arith.subf %6, %8 : vector<32x128xf32>
    %cst_7 = arith.constant -3.200000e+01 : f32
    %10 = vector.broadcast %cst_7 : f32 to vector<32x128xf32>
    %11 = arith.mulf %10, %9 : vector<32x128xf32>
    %12 = arith.mulf %11, %9 : vector<32x128xf32>
    %13 = math.exp %12 : vector<32x128xf32>
    %c0_8 = arith.constant 0 : index
    %c0_9 = arith.constant 0 : index
    %14 = vector.load %arg5[%c0_8, %c0_9] : memref<32x128xf32, #tpu.memory_space<vmem>>, vector<32x128xf32>
    tpu.vector_store %arg5[%c0_8, %c0_9], %13 {strides = array<i32>} : memref<32x128xf32, #tpu.memory_space<vmem>>, vector<32x128xf32>,
    return
  }
  func.func @transform_0(%arg0: i32) -> (i32, i32) {
    %c0_i32 = arith.constant 0 : i32
    %c0_i32_0 = arith.constant 0 : i32
    %c0_i32_1 = arith.constant 0 : i32
    return %c0_i32, %c0_i32_0 : i32, i32
  }
  func.func @transform_1(%arg0: i32) -> (i32, i32) {
    %c0_i32 = arith.constant 0 : i32
    %c0_i32_0 = arith.constant 0 : i32
    return %arg0, %c0_i32 : i32, i32
  }
  func.func @transform_2(%arg0: i32) -> (i32, i32) {
    %c0_i32 = arith.constant 0 : i32
    %c0_i32_0 = arith.constant 0 : i32
    %c0_i32_1 = arith.constant 0 : i32
    return %c0_i32, %c0_i32_0 : i32, i32
  }
  func.func @transform_3(%arg0: i32) -> (i32, i32) {
    %c0_i32 = arith.constant 0 : i32
    %c0_i32_0 = arith.constant 0 : i32
    %c0_i32_1 = arith.constant 0 : i32
    return %c0_i32, %c0_i32_0 : i32, i32
  }
  func.func @transform_4(%arg0: i32) -> (i32, i32) {
    %c0_i32 = arith.constant 0 : i32
    %c0_i32_0 = arith.constant 0 : i32
    return %arg0, %c0_i32 : i32, i32
  }
}

</mosaic_0001>

<bundles_post_ra>
// kernel: tpu_custom_call.1
= control target key start
LH: loop header
LB: loop body
LE: loop exit
PB: predicated region body
PF: predicated region fallthrough
CT: control target
= control target key end

     0   :  { %s722_s0 = inlined_call_operand.<no memory space> [shape: f32[1,1], index: 0, kind: input, shape index: {}]   ;;  %s723_s1 = inlined_call_operand.vmem [shape: f32[64,4], index: 1, kind: input, shape index: {}]   ;;  %s724_s2 = inlined_call_operand.vmem [shape: f32[1,128], index: 2, kind: input, shape index: {}]   ;;  %s725_s3 = inlined_call_operand.vmem [shape: f32[4,128], index: 3, kind: input, shape index: {}]   ;;  %s726_s4 = inlined_call_operand.hbm [shape: f32[64,128], index: 4, kind: output, shape index: {}]  }
   0x1   :  { %9 = sst [smem:[#allocation2]] %s722_s0 }
   0x2   :  { %10 = vsyncpa [#allocation4], 0 }
   0x3   :  { %12 = vsyncpa [#allocation4 + $0x1], 0  ;;  %s614_s17 = smov 0   ;;  %s616_s18 = smov 0  }
   0x4   :  { %s618_s19 = smov 0   ;;  %s620_s20 = smov 0  }
   0x5 LB: > { %s635_s0 = sadd.s32 4294967295, %s581_s20   ;;  %s428_s21 = sadd.s32 4294967294, %s581_s20   ;;  %s581_s20 = sphi %s620_s20, %s732_s20   ;;  %s577_s19 = sphi %s618_s19, %s731_s19   ;;  %s573_s18 = sphi %s616_s18, %s730_s18   ;;  %s569_s17 = sphi %s614_s17, %s729_s17  }
   0x6   : > { %s639_s22 = sadd.s32 1, %s581_s20   ;;  %s114_s23 = sadd.s32 1, %s577_s19 }
   0x7   : > { %s111_s24 = ssub.s32 %s581_s20, %s639_s22  ;;  %p124_p0 = scmp.ne.s32.totalorder %s577_s19, %s573_s18 }
   0x8   : > { %p112_p1 = scmp.eq.s32.totalorder %s111_s24, 0  ;;  %p125_p2 = scmp.eq.s32.totalorder %s635_s0, 1 }
   0x9   : > { %p130_p3 = scmp.ne.s32.totalorder %s573_s18, %s569_s17  ;;  %p131_p4 = scmp.eq.s32.totalorder %s428_s21, 1 }
   0xa   : > { %s650_s25 = scalar_select %p112_p1, %s577_s19, %s114_s23  }
   0xb   : > { %p652_p5 = por %p125_p2, %p124_p0  ;;  %p656_p6 = por %p131_p4, %p130_p3 }
   0xc   : > { %p431_p7 = scmp.ge.s32.totalorder %s581_s20, 1  ;;  %p167_p8 = scmp.lt.s32.totalorder %s581_s20, 3 }
   0xe   : > { %p168_p9 = pnand %p431_p7, %p167_p8 }
   0xf   : > { %v218_v0 = vld [vmem:[%s725_s3] sm:$0xf] (!%p168_p9)  ;;  %vm232_vm0 = vcmask (!%p168_p9), 1043456   ;;  %s433_s30 = sshll.u32 (!%p168_p9), %s635_s0, 2  ;;  %s200_s5 = sld [smem:[#allocation2]] (!%p168_p9)  ;;  %vm219_vm1 = vcmask (!%p168_p9), 31744  }
  0x10   : > { %171 = sbr.rel (%p168_p9) target bundleno = 293 (0x125), region = 36  ;;  %452 = vmatprep.subr.msk.mxu0 (!%p168_p9), %vm232_vm0, %v218_v0  ;;  %460 = vmatprep.subr.msk.mxu1 (!%p168_p9), %vm232_vm0, %v218_v0  ;;  %p194_p10 = scmp.lt.s32.totalorder (!%p168_p9), %s433_s30, 7  ;;  %v440_v18 = vld [vmem:[%s724_s2] ss:$0 sm:$0xff] (!%p168_p9) }
  0x11   : > { %453 = vmatpush3.msk.msra.mxu0 (!%p168_p9), %vm232_vm0, %v218_v0  ;;  %461 = vmatpush3.msk.msra.mxu1 (!%p168_p9), %vm232_vm0, %v218_v0  ;;  %s190_s12 = sand.u32 (!%p168_p9), 1, %s573_s18   ;;  %s446_s14 = sshll.u32 (!%p168_p9), %s635_s0, 9 }
  0x12   : > { %s432_s13 = sshll.u32 (!%p168_p9), %s190_s12, 5  ;;  %s677_s24 = scalar_lea.hbm (!%p168_p9), %s726_s4, %s446_s14 }
  0x13   : > { %s192_s15 = scalar_lea.vmem (!%p168_p9), [#allocation3], %s432_s13  ;;  %s681_s0 = scalar_lea.sflag (!%p168_p9), [#allocation4], %s190_s12 }
  0x14   : > { %s366_s16 = sshll.u32 (!%p168_p9), %s192_s15, 4  ;;  %s583_s29 = smov (!%p168_p9), [#allocation3]   ;;  %s679_s16 = int_to_ptr.vmem [resolvable:$true] %s366_s16 }
  0x15   : > { %v205_v1 = vstv (!%p168_p9), %s200_s5  ;;  %s519_s28 = scalar_lea.vmem (!%p168_p9), %s679_s16, 512 }
  0x16   : > { %p520_p11 = scmp.ne.s32.totalorder (!%p168_p9), %s679_s16, %s519_s28 }
  0x17   : > { %s734_s30 = smov (!%p194_p10, %s433_s30), 7 }
  0x18   : > { %s434_s6 = sshll.u32 %s734_s30, 3  ;;  %p521_p12 = pnand %p520_p11, %p652_p5 }
  0x19   : > { %s197_s9 = scalar_lea.vmem %s723_s1, %s434_s6  ;;  %s523_s30 = sshll.u32 %s583_s29, 4  ;;  %s524_s30 = int_to_ptr.vmem [resolvable:$false] %s523_s30 }
  0x1a   : > { %v201_v2 = vld [vmem:[%s197_s9] sm:$0xff]  ;;  %v202_v3 = vld [vmem:[%s197_s9 + $0x8] sm:$0xff]  ;;  %v204_v4 = vld [vmem:[%s197_s9 + $0x18] sm:$0xff]  ;;  %p522_p13 = pneg %p521_p12  ;;  %s525_s5 = scalar_lea.vmem %s524_s30, 1024 }
  0x1b   : > { %v206_v5 = vmul.f32 %v205_v1, %v201_v2  ;;  %v207_v6 = vmul.f32 %v205_v1, %v202_v3  ;;  %v209_v7 = vmul.f32 %v205_v1, %v204_v4  ;;  %v203_v8 = vld [vmem:[%s197_s9 + $0x10] sm:$0xff]  ;;  %p526_p0 = scmp.lt.s32.totalorder %s679_s16, %s524_s30  ;;  %p527_p1 = scmp.lt.s32.totalorder %s525_s5, %s519_s28 }
  0x1c   : > { %v208_v9 = vmul.f32 %v205_v1, %v203_v8 }
  0x1d   : > { %v210_v10 = vmul.f32 1.442695, %v206_v5  ;;  %v212_v11 = vmul.f32 1.442695, %v207_v6  ;;  %v216_v12 = vmul.f32 1.442695, %v209_v7  ;;  %p528_p2 = por %p527_p1, %p526_p0 }
  0x1e   : > { %v214_v13 = vmul.f32 1.442695, %v208_v9 }
  0x1f   : > { %503 = vpow2.f32 %v210_v10  ;;  %p529_p3 = pnand %p528_p2, %p522_p13 }
  0x20   : > { %505 = vpow2.f32 %v212_v11 }
  0x21   : > { %507 = vpow2.f32 %v216_v12 }
  0x22   : > { %509 = vpow2.f32 %v214_v13 }
  0x29   : > { %v504_v14 = vpop.eup %503 }
  0x2a   : > { %v506_v15 = vpop.eup %505  ;;  %454 = vmatprep.mubr.msk.f32.mxu0 %vm219_vm1, %v504_v14 }
  0x2b   : > { %v508_v16 = vpop.eup %507  ;;  %455 = vmatmul.mubr.msk.f32.vlgmr.msra.gmra.mrb[0].mxu0 %vm219_vm1, %v506_v15 }
  0x2c   : > { %v510_v17 = vpop.eup %509 }
  0x2d   : > { %457 = vmatprep.mubr.msk.f32.mxu1 %vm219_vm1, %v510_v17 }
  0x2e   : > { %458 = vmatmul.mubr.msk.f32.vlgmr.msra.gmra.mrb[0].mxu1 %vm219_vm1, %v508_v16 }
  0xfe   : > { %v456_v19 = vpop.f32.mrb[0].mxu0 }
  0xff   : > { %v329_v20 = vsub.f32 %v456_v19, %v440_v18  ;;  %v302_v21 = vpop.f32.mrb[1].mxu0 }
 0x100   : > { %v328_v22 = vsub.f32 %v302_v21, %v440_v18 }
 0x101   : > { %v333_v23 = vmul.f32 -32.0, %v329_v20  ;;  %v459_v24 = vpop.f32.mrb[0].mxu1 }
 0x102   : > { %v331_v25 = vsub.f32 %v459_v24, %v440_v18  ;;  %v332_v26 = vmul.f32 -32.0, %v328_v22  ;;  %v312_v27 = vpop.f32.mrb[1].mxu1 }
 0x103   : > { %v337_v28 = vmul.f32 %v333_v23, %v329_v20  ;;  %v330_v29 = vsub.f32 %v312_v27, %v440_v18 }
 0x104   : > { %v335_v30 = vmul.f32 -32.0, %v331_v25  ;;  %v336_v31 = vmul.f32 %v332_v26, %v328_v22 }
 0x105   : > { %v342_v32 = vmul.f32 1.442695, %v337_v28  ;;  %v334_v33 = vmul.f32 -32.0, %v330_v29 }
 0x106   : > { %v339_v34 = vmul.f32 %v335_v30, %v331_v25  ;;  %v340_v35 = vmul.f32 1.442695, %v336_v31 }
 0x107   : > { %511 = vpow2.f32 %v342_v32  ;;  %v338_v36 = vmul.f32 %v334_v33, %v330_v29 }
 0x108   : > { %v346_v37 = vmul.f32 1.442695, %v339_v34  ;;  %513 = vpow2.f32 %v340_v35 }
 0x109   : > { %v344_v38 = vmul.f32 1.442695, %v338_v36 }
 0x10a   : > { %515 = vpow2.f32 %v346_v37 }
 0x10b   : > { %517 = vpow2.f32 %v344_v38 }
 0x111   : > { %v512_v39 = vpop.eup %511 }
 0x112   : > { %v514_v40 = vpop.eup %513  ;;  %349 = vst [vmem:[%s192_s15 + $0x8] sm:$0xff] %v512_v39 }
 0x113   : > { %348 = vst [vmem:[%s192_s15] sm:$0xff] %v514_v40 }
 0x114   : > { %v516_v41 = vpop.eup %515 }
 0x115   : > { %v518_v42 = vpop.eup %517  ;;  %351 = vst [vmem:[%s192_s15 + $0x18] sm:$0xff] %v516_v41 }
 0x116   : > { %350 = vst [vmem:[%s192_s15 + $0x10] sm:$0xff] %v518_v42 }
 0x117   : > { %532 = shalt.err (!%p529_p3)
}
 0x118   : > { %s533_s6 = scalar_lea.hbm %s677_s24, 512  ;;  %s537_s9 = scalar_lea.hbm %s726_s4, 1024 }
 0x119   : > { %p534_p4 = scmp.ne.s32.totalorder %s677_s24, %s533_s6  ;;  %p538_p9 = scmp.lt.u32.totalorder %s677_s24, %s726_s4 }
 0x11a   : > { %p539_p10 = scmp.lt.u32.totalorder %s537_s9, %s533_s6  ;;  %p541_p12 = scmp.lt.u32.totalorder %s533_s6, %s677_s24 }
 0x11b   : > { %p535_p7 = pnand %p534_p4, %p652_p5 }
 0x11c   : > { %p540_p11 = por %p539_p10, %p538_p9 }
 0x11d   : > { %p536_p8 = pneg %p535_p7 }
 0x11e   : > { %p542_p13 = por %p541_p12, %p540_p11 }
 0x120   : > { %p543_p0 = pnand %p542_p13, %p536_p8 }
 0x122   : > { %546 = shalt.err (!%p543_p0)
}
 0x123   : > { %s584_s12 = smov 128   ;;  %s585_s13 = smov 8  }
 0x124   : > { %462 = dma.vmem_to_hbm [thread:$0]  (%p652_p5), %s679_s16, 512, %s677_s24, %s681_s0, %s584_s12, %s584_s12, %s585_s13  }
 0x125 PF: > { %p468_p1 = scmp.ge.s32.totalorder %s581_s20, 2  ;;  %s381_s14 = sand.u32 1, %s569_s17  }
 0x126   : > { %s382_s15 = scalar_lea.sflag [#allocation4], %s381_s14 }
 0x127   : > { %p465_p2 = pnand %p468_p1, %p656_p6 }
 0x129   : > { %564 = dma.done.wait (!%p465_p2), %s382_s15, 512  }
 0x12a   : > { %566 = vsyncadd (!%p465_p2), %s382_s15, 4294966784  ;;  %p15_p3 = scmp.ge.s32.totalorder %s639_s22, 4   ;;  %s729_s17 = smov %s573_s18 }
 0x12b   : > { %s730_s18 = smov %s577_s19  ;;  %s731_s19 = smov %s650_s25 }
 0x12c   : > { %s732_s20 = smov %s639_s22  ;;  %17 = sbr.rel (!%p15_p3) target bundleno = 5 (0x5), region = 71 }
 0x133   :  { %387 = vsyncpa [#allocation4], 1 }
 0x134   :  { %389 = vsyncpa [#allocation4 + $0x1], 1 }

</bundles_post_ra>
